<compile_context>
chip_gen: v5e
topology: v5e:2x2
jax: 0.10.0
libtpu: 0.0.40
codegen_flags: <defaults>
</compile_context>

<pallas_src>
from functools import partial

import numpy as np
import jax
import jax.numpy as jnp
from jax.experimental import pallas as pl
from jax.experimental.pallas import tpu as pltpu


# ----------------------------------------------------------------------------
# Fused Pallas kernel: gc1 -> SwitchNorm1D -> LeakyReLU -> gc2 -> LeakyReLU
# ----------------------------------------------------------------------------
def chebnet_fused_kernel(x_ref, lblk_ref, w1_ref, b1_ref, w2_ref, b2_ref,
                         gamma_ref, beta_ref, mix_ref, o_ref, *,
                         K, eps, negative_slope):
    L = lblk_ref[...]            # (B*S, B*S) block-diagonal Laplacian
    x = x_ref[...]               # (B*S, Cin)

    def leaky(v):
        return jnp.where(v >= 0.0, v, negative_slope * v)

    def graph_conv(x_in, w_ref, b_ref):
        # Chebyshev recursion on the batch-folded signal: each step is a
        # single MXU matmul covering the whole batch.
        acc = jnp.dot(x_in, w_ref[0], preferred_element_type=jnp.float32)
        if K >= 2:
            t_prev = x_in
            t_cur = jnp.dot(L, x_in, preferred_element_type=jnp.float32)
            acc = acc + jnp.dot(t_cur, w_ref[1],
                                preferred_element_type=jnp.float32)
            for k in range(2, K):
                t_next = (2.0 * jnp.dot(L, t_cur,
                                        preferred_element_type=jnp.float32)
                          - t_prev)
                acc = acc + jnp.dot(t_next, w_ref[k],
                                    preferred_element_type=jnp.float32)
                t_prev, t_cur = t_cur, t_next
        return acc + b_ref[...]                    # (B*S, Cout) + (1, Cout)

    # ---- gc1 -------------------------------------------------------------
    h = graph_conv(x, w1_ref, b1_ref)              # (B*S, H), f32

    # ---- SwitchNorm1D (training-mode LN/BN mixture) + affine + LeakyReLU --
    hsq = h * h                                    # one pass reused for LN+BN
    mean_ln = jnp.mean(h, axis=-1, keepdims=True)                  # (B*S, 1)
    var_ln = jnp.maximum(
        jnp.mean(hsq, axis=-1, keepdims=True) - mean_ln * mean_ln, 0.0)
    mean_bn = jnp.mean(h, axis=0, keepdims=True)                   # (1, H)
    var_bn = jnp.maximum(
        jnp.mean(hsq, axis=0, keepdims=True) - mean_bn * mean_bn, 0.0)

    # mix_ref (SMEM, f32[4]) = [softmax(mean_w)[0:2], softmax(var_w)[0:2]]
    mean = mix_ref[0] * mean_ln + mix_ref[1] * mean_bn
    var = mix_ref[2] * var_ln + mix_ref[3] * var_bn

    hn = (h - mean) * jax.lax.rsqrt(var + eps)     # rsqrt -> EUP (free slot)
    hn = leaky(hn * gamma_ref[...] + beta_ref[...])

    # ---- gc2 + LeakyReLU ---------------------------------------------------
    out = leaky(graph_conv(hn, w2_ref, b2_ref))
    o_ref[...] = out.astype(o_ref.dtype)


# ----------------------------------------------------------------------------
# Wrapper
# ----------------------------------------------------------------------------
def graph_to_laplacian(Graph):
    """L = I - D^{-1/2} A D^{-1/2} with D from row sums (Graph2L.g2L)."""
    d = jnp.sum(Graph, axis=1) ** (-0.5)
    D = jnp.diag(d)
    return (jnp.eye(Graph.shape[0], dtype=Graph.dtype) - D @ Graph @ D)


def chebnet_forward(params, inputs, Graph, *, eps=1e-5, negative_slope=0.01):
    Graph = Graph if Graph.ndim == 2 else Graph[0]          # .squeeze(0)
    L = graph_to_laplacian(Graph).astype(jnp.float32)

    B, S, Cin = inputs.shape
    K, _, H = params["gc1_w"].shape
    BS = B * S

    # Fold batch into the station axis: rows index (b, s).  The block-diagonal
    # Laplacian makes every Chebyshev matmul cover the whole batch at once.
    x2 = inputs.reshape(BS, Cin).astype(jnp.float32)
    L_blk = jnp.kron(jnp.eye(B, dtype=jnp.float32), L)      # (B*S, B*S)

    def gc_flops(cin, cout):
        rec = 2 * (K - 1) * BS * BS * cin        # Chebyshev recursion matmuls
        wmm = 2 * K * BS * cin * cout            # per-order weight matmuls
        return rec + wmm

    flops = gc_flops(Cin, H) + gc_flops(H, H) + 10 * BS * H
    bytes_accessed = 4 * (x2.size + L_blk.size
                          + params["gc1_w"].size + params["gc2_w"].size
                          + 4 * H + 4 + BS * H)

    out2 = pl.pallas_call(
        partial(chebnet_fused_kernel, K=K, eps=eps,
                negative_slope=negative_slope),
        out_shape=jax.ShapeDtypeStruct((BS, H), jnp.float32),
        in_specs=[
            pl.BlockSpec(memory_space=pltpu.MemorySpace.VMEM),  # x (B*S, Cin)
            pl.BlockSpec(memory_space=pltpu.MemorySpace.VMEM),  # L_blk
            pl.BlockSpec(memory_space=pltpu.MemorySpace.VMEM),  # W1 (K,Cin,H)
            pl.BlockSpec(memory_space=pltpu.MemorySpace.VMEM),  # b1 (1,H)
            pl.BlockSpec(memory_space=pltpu.MemorySpace.VMEM),  # W2 (K,H,H)
            pl.BlockSpec(memory_space=pltpu.MemorySpace.VMEM),  # b2 (1,H)
            pl.BlockSpec(memory_space=pltpu.MemorySpace.VMEM),  # gamma (1,H)
            pl.BlockSpec(memory_space=pltpu.MemorySpace.VMEM),  # beta (1,H)
            pl.BlockSpec(memory_space=pltpu.MemorySpace.SMEM),  # sn_mix f32[4]
        ],
        out_specs=pl.BlockSpec(memory_space=pltpu.MemorySpace.VMEM),
        cost_estimate=pl.CostEstimate(flops=int(flops),
                                      transcendentals=int(BS * H),
                                      bytes_accessed=int(bytes_accessed)),
    )(x2, L_blk,
      params["gc1_w"], params["gc1_b"].reshape(1, H),
      params["gc2_w"], params["gc2_b"].reshape(1, H),
      params["sn_gamma"].reshape(1, H), params["sn_beta"].reshape(1, H),
      params["sn_mix"])
    return out2.reshape(B, S, H)


# ----------------------------------------------------------------------------
# Pure-JAX reference (faithful to the PyTorch recursion; HIGHEST precision)
# ----------------------------------------------------------------------------
def chebnet_ref(params, x, Graph):
    Graph = Graph if Graph.ndim == 2 else Graph[0]
    L = graph_to_laplacian(Graph).astype(x.dtype)
    hi = jax.lax.Precision.HIGHEST

    def gconv(x, W, b):
        K = W.shape[0]
        T = [x]
        if K >= 2:
            T.append(jnp.einsum("ij,bjc->bic", L, x, precision=hi))
        for _ in range(2, K):
            T.append(2.0 * jnp.einsum("ij,bjc->bic", L, T[-1], precision=hi)
                     - T[-2])
        out = sum(jnp.einsum("bsd,dc->bsc", T[k], W[k], precision=hi)
                  for k in range(K))
        return out + b

    def lrelu(v):
        return jnp.where(v >= 0.0, v, 0.01 * v)

    h = gconv(x, params["gc1_w"], params["gc1_b"])
    mean_ln = h.mean(-1, keepdims=True)
    var_ln = ((h - mean_ln) ** 2).mean(-1, keepdims=True)
    mean_bn = h.mean((0, 1), keepdims=True)
    var_bn = ((h - mean_bn) ** 2).mean((0, 1), keepdims=True)
    sw = params["sn_mix"]
    mean = sw[0] * mean_ln + sw[1] * mean_bn
    var = sw[2] * var_ln + sw[3] * var_bn
    hn = (h - mean) / jnp.sqrt(var + 1e-5)
    hn = hn * params["sn_gamma"] + params["sn_beta"]
    hn = lrelu(hn)
    return lrelu(gconv(hn, params["gc2_w"], params["gc2_b"]))


# ----------------------------------------------------------------------------
# Deterministic parameter init (mirrors the PyTorch module's shapes)
# ----------------------------------------------------------------------------
def init_params(key, K, in_channel, hid_channel):
    k1, k2, k3, k4 = jax.random.split(key, 4)
    bound = 1.0 / np.sqrt(K)   # nn.Linear(K, out, bias=False) default init

    def linear_stack(k, cin, cout):
        # PyTorch: per input channel d, Linear weight (cout, K); stacked and
        # rearranged to (K, cin, cout) so W[k, d, c] == weight_d[c, k].
        w = jax.random.uniform(k, (cin, cout, K), jnp.float32, -bound, bound)
        return jnp.transpose(w, (2, 0, 1))

    params = {
        "gc1_w": linear_stack(k1, in_channel, hid_channel),
        "gc1_b": jax.random.normal(k2, (hid_channel,), jnp.float32),
        "gc2_w": linear_stack(k3, hid_channel, hid_channel),
        "gc2_b": jax.random.normal(k4, (hid_channel,), jnp.float32),
        # SwitchNorm1d params: weight=1, bias=0, mean_weight=var_weight=1s
        "sn_gamma": jnp.ones((hid_channel,), jnp.float32),
        "sn_beta": jnp.zeros((hid_channel,), jnp.float32),
        "sn_mix": jnp.concatenate([jax.nn.softmax(jnp.ones(2, jnp.float32)),
                                   jax.nn.softmax(jnp.ones(2, jnp.float32))]),
    }
    return params


# ----------------------------------------------------------------------------
if __name__ == "__main__":
    K = 3
    batch, num_stations, in_channel, hid_channel = 2, 16, 4, 32

    key = jax.random.PRNGKey(0)
    k_x, k_g, k_p = jax.random.split(key, 3)

    inputs = jax.random.normal(k_x, (batch, num_stations, in_channel),
                               jnp.float32)
    # symmetric positive adjacency with self-loops (keeps row sums > 0)
    A = jax.random.uniform(k_g, (num_stations, num_stations), jnp.float32,
                           0.1, 1.0)
    Graph = 0.5 * (A + A.T) + jnp.eye(num_stations, dtype=jnp.float32)

    params = init_params(k_p, K, in_channel, hid_channel)

    out = chebnet_forward(params, inputs, Graph)
    out = jax.block_until_ready(out)

    ref = jax.block_until_ready(chebnet_ref(params, inputs, Graph))
    assert out.shape == (batch, num_stations, hid_channel)
    np.testing.assert_allclose(np.asarray(out), np.asarray(ref),
                               rtol=1e-4, atol=1e-4)

    print("KERNEL_OK")
</pallas_src>

<mosaic_0001>
module attributes {stable_mosaic.version = 11 : i64} {
  func.func @chebnet_fused_kernel(%arg0: memref<32x4xf32, #tpu.memory_space<vmem>>, %arg1: memref<32x32xf32, #tpu.memory_space<vmem>>, %arg2: memref<3x4x32xf32, #tpu.memory_space<vmem>>, %arg3: memref<1x32xf32, #tpu.memory_space<vmem>>, %arg4: memref<3x32x32xf32, #tpu.memory_space<vmem>>, %arg5: memref<1x32xf32, #tpu.memory_space<vmem>>, %arg6: memref<1x32xf32, #tpu.memory_space<vmem>>, %arg7: memref<1x32xf32, #tpu.memory_space<vmem>>, %arg8: memref<4xf32, #tpu.memory_space<smem>>, %arg9: memref<32x32xf32, #tpu.memory_space<vmem>>) attributes {dimension_semantics = [], scalar_prefetch = 0 : i64, scratch_operands = 0 : i64, tpu.core_type = #tpu.core_type<tc>} {
    %c0 = arith.constant 0 : index
    %c0_0 = arith.constant 0 : index
    %0 = vector.load %arg1[%c0, %c0_0] : memref<32x32xf32, #tpu.memory_space<vmem>>, vector<32x32xf32>
    %c0_1 = arith.constant 0 : index
    %c0_2 = arith.constant 0 : index
    %1 = vector.load %arg0[%c0_1, %c0_2] : memref<32x4xf32, #tpu.memory_space<vmem>>, vector<32x4xf32>
    %c0_3 = arith.constant 0 : index
    %c0_4 = arith.constant 0 : index
    %c0_5 = arith.constant 0 : index
    %2 = vector.load %arg2[%c0_3, %c0_4, %c0_5] : memref<3x4x32xf32, #tpu.memory_space<vmem>>, vector<1x4x32xf32>
    %3 = vector.shape_cast %2 : vector<1x4x32xf32> to vector<4x32xf32>
    %cst = arith.constant dense<0.000000e+00> : vector<32x32xf32>
    %4 = tpu.matmul %1, %3, %cst {dimension_numbers = #tpu.dot_dimension_numbers<[1], [0], [0], [1], [0, 0, 1, 1], [], []>} : vector<32x4xf32>, vector<4x32xf32>, vector<32x32xf32> -> vector<32x32xf32>
    %cst_6 = arith.constant dense<0.000000e+00> : vector<32x4xf32>
    %5 = tpu.matmul %0, %1, %cst_6 {dimension_numbers = #tpu.dot_dimension_numbers<[1], [0], [0], [1], [0, 0, 1, 1], [], []>} : vector<32x32xf32>, vector<32x4xf32>, vector<32x4xf32> -> vector<32x4xf32>
    %c1 = arith.constant 1 : index
    %c0_7 = arith.constant 0 : index
    %c0_8 = arith.constant 0 : index
    %6 = vector.load %arg2[%c1, %c0_7, %c0_8] : memref<3x4x32xf32, #tpu.memory_space<vmem>>, vector<1x4x32xf32>
    %7 = vector.shape_cast %6 : vector<1x4x32xf32> to vector<4x32xf32>
    %cst_9 = arith.constant dense<0.000000e+00> : vector<32x32xf32>
    %8 = tpu.matmul %5, %7, %cst_9 {dimension_numbers = #tpu.dot_dimension_numbers<[1], [0], [0], [1], [0, 0, 1, 1], [], []>} : vector<32x4xf32>, vector<4x32xf32>, vector<32x32xf32> -> vector<32x32xf32>
    %9 = arith.addf %4, %8 : vector<32x32xf32>
    %cst_10 = arith.constant dense<0.000000e+00> : vector<32x4xf32>
    %10 = tpu.matmul %0, %5, %cst_10 {dimension_numbers = #tpu.dot_dimension_numbers<[1], [0], [0], [1], [0, 0, 1, 1], [], []>} : vector<32x32xf32>, vector<32x4xf32>, vector<32x4xf32> -> vector<32x4xf32>
    %cst_11 = arith.constant 2.000000e+00 : f32
    %11 = vector.broadcast %cst_11 : f32 to vector<32x4xf32>
    %12 = arith.mulf %11, %10 : vector<32x4xf32>
    %13 = arith.subf %12, %1 : vector<32x4xf32>
    %c2 = arith.constant 2 : index
    %c0_12 = arith.constant 0 : index
    %c0_13 = arith.constant 0 : index
    %14 = vector.load %arg2[%c2, %c0_12, %c0_13] : memref<3x4x32xf32, #tpu.memory_space<vmem>>, vector<1x4x32xf32>
    %15 = vector.shape_cast %14 : vector<1x4x32xf32> to vector<4x32xf32>
    %cst_14 = arith.constant dense<0.000000e+00> : vector<32x32xf32>
    %16 = tpu.matmul %13, %15, %cst_14 {dimension_numbers = #tpu.dot_dimension_numbers<[1], [0], [0], [1], [0, 0, 1, 1], [], []>} : vector<32x4xf32>, vector<4x32xf32>, vector<32x32xf32> -> vector<32x32xf32>
    %17 = arith.addf %9, %16 : vector<32x32xf32>
    %c0_15 = arith.constant 0 : index
    %c0_16 = arith.constant 0 : index
    %18 = vector.load %arg3[%c0_15, %c0_16] : memref<1x32xf32, #tpu.memory_space<vmem>>, vector<1x32xf32>
    %19 = vector.broadcast %18 : vector<1x32xf32> to vector<32x32xf32>
    %20 = arith.addf %17, %19 : vector<32x32xf32>
    %21 = arith.mulf %20, %20 : vector<32x32xf32>
    %cst_17 = arith.constant dense<0.000000e+00> : vector<32xf32>
    %22 = vector.multi_reduction <add>, %20, %cst_17 [1] : vector<32x32xf32> to vector<32xf32>
    %23 = vector.shape_cast %22 : vector<32xf32> to vector<32x1xf32>
    %cst_18 = arith.constant 3.200000e+01 : f32
    %24 = vector.broadcast %cst_18 : f32 to vector<32x1xf32>
    %25 = arith.divf %23, %24 : vector<32x1xf32>
    %cst_19 = arith.constant dense<0.000000e+00> : vector<32xf32>
    %26 = vector.multi_reduction <add>, %21, %cst_19 [1] : vector<32x32xf32> to vector<32xf32>
    %27 = vector.shape_cast %26 : vector<32xf32> to vector<32x1xf32>
    %cst_20 = arith.constant 3.200000e+01 : f32
    %28 = vector.broadcast %cst_20 : f32 to vector<32x1xf32>
    %29 = arith.divf %27, %28 : vector<32x1xf32>
    %30 = arith.mulf %25, %25 : vector<32x1xf32>
    %31 = arith.subf %29, %30 : vector<32x1xf32>
    %cst_21 = arith.constant 0.000000e+00 : f32
    %32 = vector.broadcast %cst_21 : f32 to vector<32x1xf32>
    %33 = arith.maximumf %31, %32 : vector<32x1xf32>
    %cst_22 = arith.constant dense<0.000000e+00> : vector<32xf32>
    %34 = vector.multi_reduction <add>, %20, %cst_22 [0] : vector<32x32xf32> to vector<32xf32>
    %35 = vector.shape_cast %34 : vector<32xf32> to vector<1x32xf32>
    %cst_23 = arith.constant 3.200000e+01 : f32
    %36 = vector.broadcast %cst_23 : f32 to vector<1x32xf32>
    %37 = arith.divf %35, %36 : vector<1x32xf32>
    %cst_24 = arith.constant dense<0.000000e+00> : vector<32xf32>
    %38 = vector.multi_reduction <add>, %21, %cst_24 [0] : vector<32x32xf32> to vector<32xf32>
    %39 = vector.shape_cast %38 : vector<32xf32> to vector<1x32xf32>
    %cst_25 = arith.constant 3.200000e+01 : f32
    %40 = vector.broadcast %cst_25 : f32 to vector<1x32xf32>
    %41 = arith.divf %39, %40 : vector<1x32xf32>
    %42 = arith.mulf %37, %37 : vector<1x32xf32>
    %43 = arith.subf %41, %42 : vector<1x32xf32>
    %cst_26 = arith.constant 0.000000e+00 : f32
    %44 = vector.broadcast %cst_26 : f32 to vector<1x32xf32>
    %45 = arith.maximumf %43, %44 : vector<1x32xf32>
    %c0_27 = arith.constant 0 : index
    %46 = memref.load %arg8[%c0_27] : memref<4xf32, #tpu.memory_space<smem>>
    %47 = vector.broadcast %46 : f32 to vector<32x1xf32>
    %48 = arith.mulf %47, %25 : vector<32x1xf32>
    %c1_28 = arith.constant 1 : index
    %49 = memref.load %arg8[%c1_28] : memref<4xf32, #tpu.memory_space<smem>>
    %50 = vector.broadcast %49 : f32 to vector<1x32xf32>
    %51 = arith.mulf %50, %37 : vector<1x32xf32>
    %52 = vector.broadcast %48 : vector<32x1xf32> to vector<32x32xf32>
    %53 = vector.broadcast %51 : vector<1x32xf32> to vector<32x32xf32>
    %54 = arith.addf %52, %53 : vector<32x32xf32>
    %c2_29 = arith.constant 2 : index
    %55 = memref.load %arg8[%c2_29] : memref<4xf32, #tpu.memory_space<smem>>
    %56 = vector.broadcast %55 : f32 to vector<32x1xf32>
    %57 = arith.mulf %56, %33 : vector<32x1xf32>
    %c3 = arith.constant 3 : index
    %58 = memref.load %arg8[%c3] : memref<4xf32, #tpu.memory_space<smem>>
    %59 = vector.broadcast %58 : f32 to vector<1x32xf32>
    %60 = arith.mulf %59, %45 : vector<1x32xf32>
    %61 = vector.broadcast %57 : vector<32x1xf32> to vector<32x32xf32>
    %62 = vector.broadcast %60 : vector<1x32xf32> to vector<32x32xf32>
    %63 = arith.addf %61, %62 : vector<32x32xf32>
    %64 = arith.subf %20, %54 : vector<32x32xf32>
    %cst_30 = arith.constant 9.99999974E-6 : f32
    %65 = vector.broadcast %cst_30 : f32 to vector<32x32xf32>
    %66 = arith.addf %63, %65 : vector<32x32xf32>
    %67 = math.rsqrt %66 : vector<32x32xf32>
    %68 = arith.mulf %64, %67 : vector<32x32xf32>
    %c0_31 = arith.constant 0 : index
    %c0_32 = arith.constant 0 : index
    %69 = vector.load %arg6[%c0_31, %c0_32] : memref<1x32xf32, #tpu.memory_space<vmem>>, vector<1x32xf32>
    %70 = vector.broadcast %69 : vector<1x32xf32> to vector<32x32xf32>
    %71 = arith.mulf %68, %70 : vector<32x32xf32>
    %c0_33 = arith.constant 0 : index
    %c0_34 = arith.constant 0 : index
    %72 = vector.load %arg7[%c0_33, %c0_34] : memref<1x32xf32, #tpu.memory_space<vmem>>, vector<1x32xf32>
    %73 = vector.broadcast %72 : vector<1x32xf32> to vector<32x32xf32>
    %74 = arith.addf %71, %73 : vector<32x32xf32>
    %cst_35 = arith.constant 0.000000e+00 : f32
    %75 = vector.broadcast %cst_35 : f32 to vector<32x32xf32>
    %76 = arith.cmpf oge, %74, %75 : vector<32x32xf32>
    %cst_36 = arith.constant 0.00999999977 : f32
    %77 = vector.broadcast %cst_36 : f32 to vector<32x32xf32>
    %78 = arith.mulf %77, %74 : vector<32x32xf32>
    %79 = arith.select %76, %74, %78 : vector<32x32xi1>, vector<32x32xf32>
    %c0_37 = arith.constant 0 : index
    %c0_38 = arith.constant 0 : index
    %c0_39 = arith.constant 0 : index
    %80 = vector.load %arg4[%c0_37, %c0_38, %c0_39] : memref<3x32x32xf32, #tpu.memory_space<vmem>>, vector<1x32x32xf32>
    %81 = vector.shape_cast %80 : vector<1x32x32xf32> to vector<32x32xf32>
    %cst_40 = arith.constant dense<0.000000e+00> : vector<32x32xf32>
    %82 = tpu.matmul %79, %81, %cst_40 {dimension_numbers = #tpu.dot_dimension_numbers<[1], [0], [0], [1], [0, 0, 1, 1], [], []>} : vector<32x32xf32>, vector<32x32xf32>, vector<32x32xf32> -> vector<32x32xf32>
    %cst_41 = arith.constant dense<0.000000e+00> : vector<32x32xf32>
    %83 = tpu.matmul %0, %79, %cst_41 {dimension_numbers = #tpu.dot_dimension_numbers<[1], [0], [0], [1], [0, 0, 1, 1], [], []>} : vector<32x32xf32>, vector<32x32xf32>, vector<32x32xf32> -> vector<32x32xf32>
    %c1_42 = arith.constant 1 : index
    %c0_43 = arith.constant 0 : index
    %c0_44 = arith.constant 0 : index
    %84 = vector.load %arg4[%c1_42, %c0_43, %c0_44] : memref<3x32x32xf32, #tpu.memory_space<vmem>>, vector<1x32x32xf32>
    %85 = vector.shape_cast %84 : vector<1x32x32xf32> to vector<32x32xf32>
    %cst_45 = arith.constant dense<0.000000e+00> : vector<32x32xf32>
    %86 = tpu.matmul %83, %85, %cst_45 {dimension_numbers = #tpu.dot_dimension_numbers<[1], [0], [0], [1], [0, 0, 1, 1], [], []>} : vector<32x32xf32>, vector<32x32xf32>, vector<32x32xf32> -> vector<32x32xf32>
    %87 = arith.addf %82, %86 : vector<32x32xf32>
    %cst_46 = arith.constant dense<0.000000e+00> : vector<32x32xf32>
    %88 = tpu.matmul %0, %83, %cst_46 {dimension_numbers = #tpu.dot_dimension_numbers<[1], [0], [0], [1], [0, 0, 1, 1], [], []>} : vector<32x32xf32>, vector<32x32xf32>, vector<32x32xf32> -> vector<32x32xf32>
    %cst_47 = arith.constant 2.000000e+00 : f32
    %89 = vector.broadcast %cst_47 : f32 to vector<32x32xf32>
    %90 = arith.mulf %89, %88 : vector<32x32xf32>
    %91 = arith.subf %90, %79 : vector<32x32xf32>
    %c2_48 = arith.constant 2 : index
    %c0_49 = arith.constant 0 : index
    %c0_50 = arith.constant 0 : index
    %92 = vector.load %arg4[%c2_48, %c0_49, %c0_50] : memref<3x32x32xf32, #tpu.memory_space<vmem>>, vector<1x32x32xf32>
    %93 = vector.shape_cast %92 : vector<1x32x32xf32> to vector<32x32xf32>
    %cst_51 = arith.constant dense<0.000000e+00> : vector<32x32xf32>
    %94 = tpu.matmul %91, %93, %cst_51 {dimension_numbers = #tpu.dot_dimension_numbers<[1], [0], [0], [1], [0, 0, 1, 1], [], []>} : vector<32x32xf32>, vector<32x32xf32>, vector<32x32xf32> -> vector<32x32xf32>
    %95 = arith.addf %87, %94 : vector<32x32xf32>
    %c0_52 = arith.constant 0 : index
    %c0_53 = arith.constant 0 : index
    %96 = vector.load %arg5[%c0_52, %c0_53] : memref<1x32xf32, #tpu.memory_space<vmem>>, vector<1x32xf32>
    %97 = vector.broadcast %96 : vector<1x32xf32> to vector<32x32xf32>
    %98 = arith.addf %95, %97 : vector<32x32xf32>
    %cst_54 = arith.constant 0.000000e+00 : f32
    %99 = vector.broadcast %cst_54 : f32 to vector<32x32xf32>
    %100 = arith.cmpf oge, %98, %99 : vector<32x32xf32>
    %cst_55 = arith.constant 0.00999999977 : f32
    %101 = vector.broadcast %cst_55 : f32 to vector<32x32xf32>
    %102 = arith.mulf %101, %98 : vector<32x32xf32>
    %103 = arith.select %100, %98, %102 : vector<32x32xi1>, vector<32x32xf32>
    %c0_56 = arith.constant 0 : index
    %c0_57 = arith.constant 0 : index
    %104 = vector.load %arg9[%c0_56, %c0_57] : memref<32x32xf32, #tpu.memory_space<vmem>>, vector<32x32xf32>
    tpu.vector_store %arg9[%c0_56, %c0_57], %103 {strides = array<i32>} : memref<32x32xf32, #tpu.memory_space<vmem>>, vector<32x32xf32>,
    return
  }
}

</mosaic_0001>

<bundles_post_ra>
// kernel: tpu_custom_call.1
= control target key start
LH: loop header
LB: loop body
LE: loop exit
PB: predicated region body
PF: predicated region fallthrough
CT: control target
= control target key end

     0   :  { %14 = vsyncpa [#allocation3], 0  ;;  %s1161_s0 = inlined_call_operand.vmem [shape: f32[32,4], index: 0, kind: input, shape index: {}]   ;;  %s1162_s1 = inlined_call_operand.vmem [shape: f32[32,32], index: 1, kind: input, shape index: {}]   ;;  %s1163_s2 = inlined_call_operand.hbm [shape: f32[3,4,32], index: 2, kind: input, shape index: {}]   ;;  %s1164_s3 = inlined_call_operand.vmem [shape: f32[1,32], index: 3, kind: input, shape index: {}]   ;;  %s1165_s4 = inlined_call_operand.hbm [shape: f32[3,32,32], index: 4, kind: input, shape index: {}]   ;;  %s1166_s5 = inlined_call_operand.vmem [shape: f32[1,32], index: 5, kind: input, shape index: {}]   ;;  %s1167_s6 = inlined_call_operand.vmem [shape: f32[1,32], index: 6, kind: input, shape index: {}]   ;;  %s1168_s7 = inlined_call_operand.vmem [shape: f32[1,32], index: 7, kind: input, shape index: {}]   ;;  %s1169_s8 = inlined_call_operand.vmem [shape: f32[4], index: 8, kind: input, shape index: {}]   ;;  %s1170_s9 = inlined_call_operand.hbm [shape: f32[32,32], index: 9, kind: output, shape index: {}]  }
   0x1   :  { %15 = vsyncpa [#allocation7], 0 }
   0x2   :  { %16 = vsyncpa [#allocation5], 0 }
   0x3   :  { %17 = vsyncpa [#allocation4], 0  ;;  %s26_s11 = sshll.u32 %s1163_s2, 4  ;;  %s915_s12 = smov [#allocation2]   ;;  %s27_s11 = int_to_ptr.hbm [resolvable:$true] %s26_s11 }
   0x4   :  { %s28_s13 = sshll.u32 %s915_s12, 4  ;;  %s41_s16 = sshll.u32 %s1165_s4, 4  ;;  %s29_s13 = int_to_ptr.vmem [resolvable:$true] %s28_s13  ;;  %s42_s16 = int_to_ptr.hbm [resolvable:$true] %s41_s16 }
   0x5   :  { %s916_s17 = smov 64   ;;  %s917_s18 = smov 4  }
   0x6   :  { %34 = dma.hbm_to_vmem [thread:$0]  %s27_s11, 192, %s29_s13, [#allocation3], %s916_s17, %s916_s17, %s917_s18  }
   0x7   :  { %s918_s19 = smov [#allocation6]   ;;  %s919_s21 = smov 128  }
   0x8   :  { %s43_s20 = sshll.u32 %s918_s19, 4  ;;  %s920_s22 = smov 8   ;;  %s44_s20 = int_to_ptr.vmem [resolvable:$true] %s43_s20 }
   0x9   :  { %49 = dma.hbm_to_vmem [thread:$0]  %s42_s16, 1536, %s44_s20, [#allocation7], %s919_s21, %s919_s21, %s920_s22  }
   0xa   :  { %s61_s24 = sshll.u32 %s1169_s8, 4  ;;  %s921_s25 = smov [#allocation8]   ;;  %s62_s24 = int_to_ptr.vmem [resolvable:$true] %s61_s24 }
   0xb   :  { %64 = dma.vmem_to_smem %s62_s24, 16, %s921_s25, [#allocation5]  }
   0xc   :  { %907 = dma.done.wait [#allocation3], 192  }
   0xd   :  { %908 = vsyncadd [#allocation3], 4294967104 }
   0xe   :  { %909 = dma.done.wait [#allocation7], 1536  }
   0xf   :  { %910 = vsyncadd [#allocation7], 4294965760 }
  0x10   :  { %911 = dma.done.wait [#allocation5], 16  }
  0x11   :  { %912 = vsyncadd [#allocation5], 4294967280 }
  0x12   :  { %77 = sfence }
  0x13   :  { %v989_v0 = vld [vmem:[%s1161_s0 + $0x18] sm:$0xff]  ;;  %v84_v1 = vld [vmem:[%s1161_s0 + $0x10] sm:$0xff]  ;;  %vm144_vm0 = vcmask 1043456   ;;  %vm131_vm1 = vcmask 31744   ;;  %v83_v2 = vld [vmem:[%s1161_s0 + $0x8] sm:$0xff]  ;;  %vm87_vm2 = vcmask 261120  }
  0x14   :  { %112 = vmatpush.msra.mxu0 %v989_v0  ;;  %v82_v3 = vld [vmem:[%s1161_s0] sm:$0xff]  ;;  %v1015_v6 = vld [vmem:[%s1162_s1 + $0x8] sm:$0xff]  ;;  %v1023_v7 = vld [vmem:[%s1162_s1 + $0x10] sm:$0xff]  ;;  %v922_v53 = vmov 32.0   ;;  %s776_s19 = sld [smem:[#allocation8 + $0x2]]  ;;  %s737_s8 = sshll.u32 %s1170_s9, 4  ;;  %s738_s8 = int_to_ptr.hbm [resolvable:$true] %s737_s8 }
  0x15   :  { %v86_v4 = vld [vmem:[#allocation2] sm:$0xf]  ;;  %v1032_v8 = vld [vmem:[%s1162_s1 + $0x18] sm:$0xff]  ;;  %v130_v9 = vld [vmem:[#allocation2 + $0x4] sm:$0xf]  ;;  %813 = vrcp.f32 %v922_v53  ;;  %s1091_s20 = sld [smem:[#allocation8 + $0x1]] }
  0x16   :  { %113 = vmatpush.msra.mxu0 %v84_v1  ;;  %761 = vmatpush.msk.msra.mxu2 %vm144_vm0, %v86_v4  ;;  %v1007_v5 = vld [vmem:[%s1162_s1] sm:$0xff]  ;;  %v259_v14 = vld [vmem:[#allocation2 + $0x8] sm:$0xf]  ;;  %s394_s2 = sld [smem:[#allocation8]] }
  0x17   :  { %762 = vmatmul.msk.f32.vlgmr.msra.gmra.mxu2 %vm131_vm1, %v82_v3  ;;  %799 = vmatpush.msk.msra.mxu3 %vm144_vm0, %v86_v4  ;;  %v809_v38 = vld [vmem:[%s1164_s3] ss:$0 sm:$0xff]  ;;  %s777_s3 = sld [smem:[#allocation8 + $0x3]] }
  0x18   :  { %114 = vmatpush.msra.mxu0 %v83_v2  ;;  %763 = vmatmul.msk.f32.vlgmr.msra.gmra.mxu3 %vm131_vm1, %v83_v2 }
  0x19   :  { %798 = vmatpush.msk.msra.mxu1 %vm144_vm0, %v130_v9 }
  0x1a   :  { %115 = vmatpush.msra.mxu0 %v82_v3 }
  0x1b   :  { %752 = vmatmul.msk.f32.vlgmr.msra.gmra.mxu0 %vm87_vm2, %v1007_v5  ;;  %770 = vmatpush.msk.msrb.mxu1 %vm144_vm0, %v259_v14  ;;  %v814_v59 = vpop.eup %813 }
  0x1c   :  { %756 = vmatpush.msk.msrb.mxu0 %vm144_vm0, %v130_v9  ;;  %vm337_vm3 = vweird.f32 %v814_v59 }
  0x20   :  { %764 = vmatmul.msk.f32.gmra.mxu3 %vm131_vm1, %v84_v1 }
  0x23   :  { %753 = vmatmul.msk.f32.gmra.mxu0 %vm87_vm2, %v1015_v6 }
  0x28   :  { %765 = vmatmul.msk.f32.gmra.mxu3 %vm131_vm1, %v989_v0 }
  0x2b   :  { %754 = vmatmul.msk.f32.gmra.mxu0 %vm87_vm2, %v1023_v7 }
  0x33   :  { %755 = vmatmul.msk.f32.gmra.mxu0 %vm87_vm2, %v1032_v8 }
  0x98   :  { %v117_v10 = vpop.f32.mrf.mxu0 }
  0x99   :  { %757 = vmatmul.msk.f32.vlgmr.msrb.gmra.mxu0 %vm131_vm1, %v117_v10 }
  0x9a   :  { %v209_v34 = vpop.f32.mrf.mxu2 }
  0x9b   :  { %v212_v15 = vpop.f32.mrf.mxu3 }
  0xa0   :  { %v120_v11 = vpop.f32.mrf.mxu0 }
  0xa1   :  { %758 = vmatmul.msk.f32.vlgmr.msra.gmra.mxu1 %vm131_vm1, %v120_v11 }
  0xa3   :  { %v215_v16 = vpop.f32.mrf.mxu3 }
  0xa8   :  { %v123_v12 = vpop.f32.mrf.mxu0 }
  0xa9   :  { %759 = vmatmul.msk.f32.gmra.mxu1 %vm131_vm1, %v123_v12 }
  0xab   :  { %v218_v17 = vpop.f32.mrf.mxu3 }
  0xb0   :  { %v126_v13 = vpop.f32.mrf.mxu0 }
  0xb1   :  { %760 = vmatmul.msk.f32.gmra.mxu1 %vm131_vm1, %v126_v13  ;;  %233 = vmatpush.msrb.mxu3 %v126_v13 }
  0xb3   :  { %234 = vmatpush.msrb.mxu3 %v123_v12 }
  0xb5   :  { %235 = vmatpush.msrb.mxu3 %v120_v11 }
  0xb7   :  { %236 = vmatpush.msrb.mxu3 %v117_v10 }
  0xb8   :  { %766 = vmatmul.msk.f32.vlgmr.msrb.gmra.mxu3 %vm87_vm2, %v1007_v5 }
  0xc0   :  { %767 = vmatmul.msk.f32.gmra.mxu3 %vm87_vm2, %v1015_v6 }
  0xc8   :  { %768 = vmatmul.msk.f32.gmra.mxu3 %vm87_vm2, %v1023_v7 }
  0xd0   :  { %769 = vmatmul.msk.f32.gmra.mxu3 %vm87_vm2, %v1032_v8 }
 0x116   :  { %v165_v33 = vpop.f32.mrf.mxu0 }
 0x117   :  { %v210_v36 = vadd.f32 %v209_v34, %v165_v33 }
 0x11e   :  { %v168_v30 = vpop.f32.mrf.mxu1 }
 0x11f   :  { %v213_v39 = vadd.f32 %v212_v15, %v168_v30 }
 0x126   :  { %v171_v31 = vpop.f32.mrf.mxu1 }
 0x127   :  { %v216_v49 = vadd.f32 %v215_v16, %v171_v31 }
 0x12e   :  { %v174_v32 = vpop.f32.mrf.mxu1 }
 0x12f   :  { %v219_v61 = vadd.f32 %v218_v17, %v174_v32 }
 0x13b   :  { %v238_v18 = vpop.f32.mrf.mxu3 }
 0x13c   :  { %v250_v19 = vmul.f32 2.0, %v238_v18 }
 0x13e   :  { %v254_v20 = vsub.f32 %v250_v19, %v82_v3 }
 0x140   :  { %771 = vmatmul.msk.f32.vlgmr.msrb.gmra.mxu1 %vm131_vm1, %v254_v20 }
 0x143   :  { %v241_v21 = vpop.f32.mrf.mxu3 }
 0x144   :  { %v251_v22 = vmul.f32 2.0, %v241_v21 }
 0x146   :  { %v255_v23 = vsub.f32 %v251_v22, %v83_v2  ;;  %v333_v2 = vmul.f32 32.0, %v814_v59 }
 0x148   :  { %772 = vmatmul.msk.f32.gmra.mxu1 %vm131_vm1, %v255_v23  ;;  %v334_v10 = vsub.f32 1.0, %v333_v2  ;;  %v503_v2 = vld [vmem:[#allocation6 + $0x18] sm:$0xff] }
 0x149   :  { %603 = vmatpush.msra.mxu3 %v503_v2 }
 0x14a   :  { %v335_v15 = vmul.f32 %v814_v59, %v334_v10 }
 0x14b   :  { %v244_v24 = vpop.f32.mrf.mxu3 }
 0x14c   :  { %v252_v25 = vmul.f32 2.0, %v244_v24  ;;  %v336_v20 = vadd.f32 %v814_v59, %v335_v15 }
 0x14e   :  { %v256_v26 = vsub.f32 %v252_v25, %v84_v1  ;;  %v338_v25 = vsel %vm337_vm3, %v814_v59, %v336_v20 }
 0x150   :  { %773 = vmatmul.msk.f32.gmra.mxu1 %vm131_vm1, %v256_v26 }
 0x153   :  { %v247_v27 = vpop.f32.mrf.mxu3 }
 0x154   :  { %v253_v28 = vmul.f32 2.0, %v247_v27 }
 0x156   :  { %v257_v29 = vsub.f32 %v253_v28, %v989_v0 }
 0x158   :  { %774 = vmatmul.msk.f32.gmra.mxu1 %vm131_vm1, %v257_v29 }
 0x1bd   :  { %v292_v35 = vpop.f32.mrf.mxu1 }
 0x1be   :  { %v304_v37 = vadd.f32 %v292_v35, %v210_v36 }
 0x1c0   :  { %v1059_v40 = vadd.f32 %v809_v38, %v304_v37 }
 0x1c2   :  { %v316_v44 = vmul.f32 %v1059_v40, %v1059_v40  ;;  %v320_v46 = vsel %vm87_vm2, %v1059_v40, 0.0 }
 0x1c4   :  { %v343_v51 = vsel %vm87_vm2, %v316_v44, 0.0  ;;  %v414_v44 = vstv %s777_s3 }
 0x1c5   :  { %v295_v41 = vpop.f32.mrf.mxu1 }
 0x1c6   :  { %v305_v42 = vadd.f32 %v295_v41, %v213_v39 }
 0x1c8   :  { %v1061_v43 = vadd.f32 %v809_v38, %v305_v42  ;;  %v408_v42 = vstv %s776_s19 }
 0x1ca   :  { %v323_v45 = vsel %vm87_vm2, %v1061_v43, 0.0  ;;  %v317_v47 = vmul.f32 %v1061_v43, %v1061_v43 }
 0x1cb   :  { %324 = vadd.xlane.f32.xlu1 %v323_v45  ;;  %v371_v48 = vadd.f32 %v323_v45, %v320_v46 }
 0x1cc   :  { %v346_v50 = vsel %vm87_vm2, %v317_v47, 0.0 }
 0x1cd   :  { %v298_v52 = vpop.f32.mrf.mxu1  ;;  %v381_v54 = vadd.f32 %v346_v50, %v343_v51 }
 0x1ce   :  { %v306_v55 = vadd.f32 %v298_v52, %v216_v49 }
 0x1d0   :  { %v1073_v56 = vadd.f32 %v809_v38, %v306_v55 }
 0x1d2   :  { %v326_v57 = vsel %vm87_vm2, %v1073_v56, 0.0  ;;  %v318_v58 = vmul.f32 %v1073_v56, %v1073_v56 }
 0x1d3   :  { %327 = vadd.xlane.f32.xlu0 %v326_v57  ;;  %v372_v60 = vadd.f32 %v371_v48, %v326_v57 }
 0x1d4   :  { %v349_v62 = vsel %vm87_vm2, %v318_v58, 0.0 }
 0x1d5   :  { %350 = vadd.xlane.f32.xlu2 %v349_v62  ;;  %v301_v63 = vpop.f32.mrf.mxu1  ;;  %v382_v0 = vadd.f32 %v381_v54, %v349_v62 }
 0x1d6   :  { %v307_v1 = vadd.f32 %v301_v63, %v219_v61 }
 0x1d8   :  { %v1080_v3 = vadd.f32 %v809_v38, %v307_v1 }
 0x1da   :  { %v329_v4 = vsel %vm87_vm2, %v1080_v3, 0.0  ;;  %v319_v9 = vmul.f32 %v1080_v3, %v1080_v3 }
 0x1db   :  { %330 = vadd.xlane.f32.xlu0 %v329_v4  ;;  %v373_v11 = vadd.f32 %v372_v60, %v329_v4 }
 0x1dc   :  { %v352_v12 = vsel %vm87_vm2, %v319_v9, 0.0 }
 0x1dd   :  { %353 = vadd.xlane.f32.xlu1 %v352_v12  ;;  %321 = vadd.xlane.f32.xlu2 %v320_v46  ;;  %v374_v13 = vrot.slane %v373_v11, 4  ;;  %v383_v14 = vadd.f32 %v382_v0, %v352_v12  ;;  %v502_v12 = vld [vmem:[#allocation6 + $0x10] sm:$0xff] }
 0x1de   :  { %604 = vmatpush.msra.mxu3 %v502_v12 }
 0x1df   :  { %v375_v16 = vadd.f32 %v374_v13, %v373_v11  ;;  %v384_v17 = vrot.slane %v383_v14, 4  ;;  %v501_v13 = vld [vmem:[#allocation6 + $0x8] sm:$0xff] }
 0x1e0   :  { %605 = vmatpush.msra.mxu3 %v501_v13 }
 0x1e1   :  { %v376_v18 = vrot.slane %v375_v16, 2  ;;  %v385_v19 = vadd.f32 %v384_v17, %v383_v14 }
 0x1e3   :  { %v377_v21 = vadd.f32 %v376_v18, %v375_v16  ;;  %347 = vadd.xlane.f32.xlu0 %v346_v50  ;;  %v386_v22 = vrot.slane %v385_v19, 2  ;;  %v395_v18 = vstv %s394_s2 }
 0x1e5   :  { %v378_v23 = vrot.slane %v377_v21, 1  ;;  %344 = vadd.xlane.f32.xlu1 %v343_v51  ;;  %v387_v24 = vadd.f32 %v386_v22, %v385_v19  ;;  %v401_v19 = vstv %s1091_s20 }
 0x1e7   :  { %v379_v26 = vadd.f32 %v378_v23, %v377_v21  ;;  %v388_v27 = vrot.slane %v387_v24, 1 }
 0x1e9   :  { %v1087_v28 = vmul.f32 %v379_v26, %v338_v25  ;;  %v389_v29 = vadd.f32 %v388_v27, %v387_v24  ;;  %v500_v26 = vld [vmem:[#allocation6] sm:$0xff] }
 0x1ea   :  { %606 = vmatpush.msra.mxu3 %v500_v26  ;;  %v537_v26 = vld [vmem:[#allocation6 + $0x38] sm:$0xff] }
 0x1eb   :  { %v391_v30 = vmul.f32 %v1087_v28, %v1087_v28  ;;  %v390_v31 = vmul.f32 %v389_v29, %v338_v25  ;;  %562 = vmatpush.msra.mxu0 %v537_v26 }
 0x1ed   :  { %v392_v32 = vsub.f32 %v390_v31, %v391_v30 }
 0x1ef   :  { %v393_v39 = vmax.f32 %v392_v32, 0.0 }
 0x1f1   :  { %v415_v48 = vmul.f32 %v414_v44, %v393_v39 }
 0x23e   :  { %v325_v35 = vpop.xlane.xlu1 %324 }
 0x23f   :  { %v1093_v55 = vmul.f32 %v338_v25, %v325_v35 }
 0x241   :  { %v360_v62 = vmul.f32 %v1093_v55, %v1093_v55 }
 0x246   :  { %v328_v33 = vpop.xlane.xlu0 %327 }
 0x247   :  { %v341_v34 = vmul.f32 %v338_v25, %v328_v33 }
 0x248   :  { %v351_v36 = vpop.xlane.xlu2 %350 }
 0x249   :  { %v361_v37 = vmul.f32 %v341_v34, %v341_v34  ;;  %v357_v38 = vmul.f32 %v351_v36, %v338_v25  ;;  %v398_v21 = vmul.f32 %v395_v18, %v341_v34 }
 0x24b   :  { %v365_v41 = vsub.f32 %v357_v38, %v361_v37 }
 0x24d   :  { %v369_v45 = vmax.f32 %v365_v41, 0.0 }
 0x24e   :  { %v331_v46 = vpop.xlane.xlu0 %330 }
 0x24f   :  { %v411_v47 = vmul.f32 %v408_v42, %v369_v45  ;;  %v342_v49 = vmul.f32 %v338_v25, %v331_v46 }
 0x250   :  { %v354_v50 = vpop.xlane.xlu1 %353  ;;  %v322_v54 = vpop.xlane.xlu2 %321 }
 0x251   :  { %v418_v51 = vadd.f32 %v415_v48, %v411_v47  ;;  %v362_v52 = vmul.f32 %v342_v49, %v342_v49  ;;  %v358_v53 = vmul.f32 %v354_v50, %v338_v25  ;;  %v339_v60 = vmul.f32 %v338_v25, %v322_v54 }
 0x252   :  { %v399_v41 = vmul.f32 %v395_v18, %v342_v49 }
 0x253   :  { %v426_v57 = vadd.f32 1e-05, %v418_v51  ;;  %v366_v58 = vsub.f32 %v358_v53, %v362_v52  ;;  %v359_v9 = vmul.f32 %v339_v60, %v339_v60  ;;  %v397_v53 = vmul.f32 %v395_v18, %v1093_v55 }
 0x255   :  { %815 = vrsqrt.f32 %v426_v57  ;;  %v370_v59 = vmax.f32 %v366_v58, 0.0  ;;  %vm454_vm5 = vweird.f32 %v426_v57 }
 0x256   :  { %v348_v61 = vpop.xlane.xlu0 %347 }
 0x257   :  { %v412_v63 = vmul.f32 %v408_v42, %v370_v59  ;;  %v356_v0 = vmul.f32 %v348_v61, %v338_v25  ;;  %v811_v59 = vld [vmem:[%s1168_s7] ss:$0 sm:$0xff] }
 0x258   :  { %v345_v1 = vpop.xlane.xlu1 %344 }
 0x259   :  { %v419_v4 = vadd.f32 %v415_v48, %v412_v63  ;;  %v364_v10 = vsub.f32 %v356_v0, %v360_v62  ;;  %v355_v11 = vmul.f32 %v345_v1, %v338_v25  ;;  %v402_v25 = vmul.f32 %v401_v19, %v1087_v28 }
 0x25b   :  { %v816_v14 = vpop.eup %815  ;;  %v427_v15 = vadd.f32 1e-05, %v419_v4  ;;  %v368_v16 = vmax.f32 %v364_v10, 0.0  ;;  %v363_v17 = vsub.f32 %v355_v11, %v359_v9  ;;  %v405_v31 = vadd.f32 %v402_v25, %v398_v21 }
 0x25c   :  { %v449_v20 = vmul.f32 %v816_v14, %v426_v57  ;;  %vm455_vm4 = vweird.f32 %v816_v14  ;;  %v406_v47 = vadd.f32 %v402_v25, %v399_v41  ;;  %v404_v1 = vadd.f32 %v402_v25, %v397_v53  ;;  %v660_v41 = vld [vmem:[#allocation6 + $0x50] sm:$0xff] }
 0x25d   :  { %817 = vrsqrt.f32 %v427_v15  ;;  %v410_v22 = vmul.f32 %v408_v42, %v368_v16  ;;  %v367_v23 = vmax.f32 %v363_v17, 0.0  ;;  %v422_v39 = vsub.f32 %v1073_v56, %v405_v31  ;;  %vm456_vm6 = vmor %vm454_vm5, %vm455_vm4 }
 0x25e   :  { %v450_v24 = vmul.f32 %v816_v14, %v449_v20  ;;  %v396_v56 = vmul.f32 %v395_v18, %v339_v60  ;;  %vm464_vm8 = vweird.f32 %v427_v15  ;;  %v423_v58 = vsub.f32 %v1080_v3, %v406_v47 }
 0x25f   :  { %v417_v27 = vadd.f32 %v415_v48, %v410_v22  ;;  %v409_v29 = vmul.f32 %v408_v42, %v367_v23  ;;  %v421_v12 = vsub.f32 %v1061_v43, %v404_v1 }
 0x260   :  { %v451_v30 = vmul.f32 0.5, %v450_v24  ;;  %v403_v4 = vadd.f32 %v402_v25, %v396_v56  ;;  %v536_v25 = vld [vmem:[#allocation6 + $0x30] sm:$0xff] }
 0x261   :  { %v425_v32 = vadd.f32 1e-05, %v417_v27  ;;  %v416_v33 = vadd.f32 %v415_v48, %v409_v29  ;;  %v810_v48 = vld [vmem:[%s1167_s6] ss:$0 sm:$0xff]  ;;  %563 = vmatpush.msra.mxu0 %v536_v25 }
 0x262   :  { %v452_v35 = vsub.f32 1.5, %v451_v30  ;;  %v535_v30 = vld [vmem:[#allocation6 + $0x28] sm:$0xff] }
 0x263   :  { %v818_v36 = vpop.eup %817  ;;  %819 = vrsqrt.f32 %v425_v32  ;;  %v424_v34 = vadd.f32 1e-05, %v416_v33  ;;  %vm444_vm11 = vweird.f32 %v425_v32  ;;  %564 = vmatpush.msra.mxu0 %v535_v30 }
 0x264   :  { %v459_v37 = vmul.f32 %v818_v36, %v427_v15  ;;  %v453_v38 = vmul.f32 %v816_v14, %v452_v35  ;;  %vm465_vm7 = vweird.f32 %v818_v36  ;;  %v534_v35 = vld [vmem:[#allocation6 + $0x20] sm:$0xff] }
 0x265   :  { %821 = vrsqrt.f32 %v424_v34  ;;  %vm466_vm9 = vmor %vm464_vm8, %vm465_vm7  ;;  %vm434_vm14 = vweird.f32 %v424_v34  ;;  %565 = vmatpush.msra.mxu0 %v534_v35 }
 0x266   :  { %v460_v28 = vmul.f32 %v818_v36, %v459_v37  ;;  %v457_v42 = vsel %vm456_vm6, %v816_v14, %v453_v38  ;;  %v420_v14 = vsub.f32 %v1059_v40, %v403_v4 }
 0x267   :  { %v470_v44 = vmul.f32 %v457_v42, %v422_v39  ;;  %v661_v39 = vld [vmem:[#allocation6 + $0x58] sm:$0xff]  ;;  %v658_v42 = vld [vmem:[#allocation6 + $0x40] sm:$0xff] }
 0x268   :  { %v461_v45 = vmul.f32 0.5, %v460_v28  ;;  %v659_v28 = vld [vmem:[#allocation6 + $0x48] sm:$0xff] }
 0x269   :  { %v820_v46 = vpop.eup %819  ;;  %v478_v61 = vmul.f32 %v810_v48, %v470_v44 }
 0x26a   :  { %v462_v50 = vsub.f32 1.5, %v461_v45  ;;  %v439_v51 = vmul.f32 %v820_v46, %v425_v32  ;;  %vm445_vm10 = vweird.f32 %v820_v46 }
 0x26b   :  { %v822_v52 = vpop.eup %821  ;;  %v486_v10 = vadd.f32 %v811_v59, %v478_v61  ;;  %vm446_vm13 = vmor %vm444_vm11, %vm445_vm10 }
 0x26c   :  { %v440_v49 = vmul.f32 %v820_v46, %v439_v51  ;;  %v429_v54 = vmul.f32 %v822_v52, %v424_v34  ;;  %v463_v57 = vmul.f32 %v818_v36, %v462_v50  ;;  %vm435_vm12 = vweird.f32 %v822_v52 }
 0x26d   :  { %vm436_vm15 = vmor %vm434_vm14, %vm435_vm12  ;;  %v494_v18 = vmul.f32 0.01, %v486_v10  ;;  %vm490_vm1 = vcmp.ge.f32.partialorder %v486_v10, 0.0 }
 0x26e   :  { %v441_v62 = vmul.f32 0.5, %v440_v49  ;;  %v430_v63 = vmul.f32 %v822_v52, %v429_v54  ;;  %v467_v0 = vsel %vm466_vm9, %v818_v36, %v463_v57  ;;  %v812_v54 = vld [vmem:[%s1166_s5] ss:$0 sm:$0xff]  ;;  %s923_s5 = smov [#allocation9]  }
 0x26f   :  { %v471_v2 = vmul.f32 %v467_v0, %v423_v58  ;;  %v1113_v43 = vsel %vm490_vm1, %v486_v10, %v494_v18  ;;  %s735_s26 = sshll.u32 %s923_s5, 4  ;;  %s736_s26 = int_to_ptr.vmem [resolvable:$true] %s735_s26 }
 0x270   :  { %v442_v55 = vsub.f32 1.5, %v441_v62  ;;  %v431_v60 = vmul.f32 0.5, %v430_v63 }
 0x271   :  { %v479_v9 = vmul.f32 %v810_v48, %v471_v2 }
 0x272   :  { %v432_v11 = vsub.f32 1.5, %v431_v60  ;;  %v443_v3 = vmul.f32 %v820_v46, %v442_v55 }
 0x273   :  { %v487_v13 = vadd.f32 %v811_v59, %v479_v9 }
 0x274   :  { %v447_v15 = vsel %vm446_vm13, %v820_v46, %v443_v3  ;;  %v433_v16 = vmul.f32 %v822_v52, %v432_v11 }
 0x275   :  { %vm491_vm0 = vcmp.ge.f32.partialorder %v487_v13, 0.0  ;;  %v495_v17 = vmul.f32 0.01, %v487_v13  ;;  %v469_v19 = vmul.f32 %v447_v15, %v421_v12 }
 0x276   :  { %v437_v20 = vsel %vm436_vm15, %v822_v52, %v433_v16 }
 0x277   :  { %v1110_v21 = vsel %vm491_vm0, %v487_v13, %v495_v17  ;;  %v477_v22 = vmul.f32 %v810_v48, %v469_v19  ;;  %v468_v23 = vmul.f32 %v437_v20, %v420_v14 }
 0x278   :  { %516 = vmatpush.msrb.mxu2 %v1110_v21 }
 0x279   :  { %v485_v24 = vadd.f32 %v811_v59, %v477_v22  ;;  %v476_v40 = vmul.f32 %v810_v48, %v468_v23 }
 0x27a   :  { %517 = vmatpush.msrb.mxu2 %v1113_v43 }
 0x27b   :  { %vm489_vm3 = vcmp.ge.f32.partialorder %v485_v24, 0.0  ;;  %v493_v27 = vmul.f32 0.01, %v485_v24  ;;  %v484_v29 = vadd.f32 %v811_v59, %v476_v40 }
 0x27d   :  { %v497_v31 = vsel %vm489_vm3, %v485_v24, %v493_v27  ;;  %vm488_vm4 = vcmp.ge.f32.partialorder %v484_v29, 0.0  ;;  %v492_v32 = vmul.f32 0.01, %v484_v29 }
 0x27e   :  { %518 = vmatpush.msrb.mxu2 %v497_v31 }
 0x27f   :  { %v496_v33 = vsel %vm488_vm4, %v484_v29, %v492_v32 }
 0x280   :  { %519 = vmatpush.msrb.mxu2 %v496_v33  ;;  %786 = vmatmul.msk.f32.vlgmr.msra.gmra.mxu3 %vm87_vm2, %v496_v33 }
 0x281   :  { %778 = vmatmul.msk.f32.vlgmr.msrb.gmra.mxu2 %vm87_vm2, %v1007_v5 }
 0x282   :  { %686 = vmatpush.msra.mxu2 %v661_v39 }
 0x284   :  { %687 = vmatpush.msra.mxu2 %v660_v41 }
 0x286   :  { %688 = vmatpush.msra.mxu2 %v659_v28 }
 0x288   :  { %787 = vmatmul.msk.f32.gmra.mxu3 %vm87_vm2, %v497_v31  ;;  %689 = vmatpush.msra.mxu2 %v658_v42 }
 0x289   :  { %779 = vmatmul.msk.f32.gmra.mxu2 %vm87_vm2, %v1015_v6 }
 0x290   :  { %788 = vmatmul.msk.f32.gmra.mxu3 %vm87_vm2, %v1113_v43 }
 0x291   :  { %780 = vmatmul.msk.f32.gmra.mxu2 %vm87_vm2, %v1023_v7 }
 0x298   :  { %789 = vmatmul.msk.f32.gmra.mxu3 %vm87_vm2, %v1110_v21 }
 0x299   :  { %781 = vmatmul.msk.f32.gmra.mxu2 %vm87_vm2, %v1032_v8 }
 0x303   :  { %v608_v56 = vpop.f32.mrf.mxu3 }
 0x304   :  { %v521_v36 = vpop.f32.mrf.mxu2 }
 0x305   :  { %782 = vmatmul.msk.f32.vlgmr.msra.gmra.mxu0 %vm87_vm2, %v521_v36 }
 0x30b   :  { %v611_v61 = vpop.f32.mrf.mxu3 }
 0x30c   :  { %v524_v34 = vpop.f32.mrf.mxu2 }
 0x30d   :  { %783 = vmatmul.msk.f32.gmra.mxu0 %vm87_vm2, %v524_v34 }
 0x313   :  { %v614_v9 = vpop.f32.mrf.mxu3 }
 0x314   :  { %v527_v37 = vpop.f32.mrf.mxu2 }
 0x315   :  { %784 = vmatmul.msk.f32.gmra.mxu0 %vm87_vm2, %v527_v37 }
 0x31b   :  { %v617_v17 = vpop.f32.mrf.mxu3 }
 0x31c   :  { %v530_v38 = vpop.f32.mrf.mxu2 }
 0x31d   :  { %785 = vmatmul.msk.f32.gmra.mxu0 %vm87_vm2, %v530_v38  ;;  %632 = vmatpush.msra.mxu1 %v530_v38 }
 0x31f   :  { %633 = vmatpush.msra.mxu1 %v527_v37 }
 0x321   :  { %634 = vmatpush.msra.mxu1 %v524_v34 }
 0x323   :  { %635 = vmatpush.msra.mxu1 %v521_v36 }
 0x324   :  { %790 = vmatmul.msk.f32.vlgmr.msra.gmra.mxu1 %vm87_vm2, %v1007_v5 }
 0x32c   :  { %791 = vmatmul.msk.f32.gmra.mxu1 %vm87_vm2, %v1015_v6 }
 0x334   :  { %792 = vmatmul.msk.f32.gmra.mxu1 %vm87_vm2, %v1023_v7 }
 0x33c   :  { %793 = vmatmul.msk.f32.gmra.mxu1 %vm87_vm2, %v1032_v8 }
 0x382   :  { %v567_v53 = vpop.f32.mrf.mxu0 }
 0x383   :  { %v609_v49 = vadd.f32 %v608_v56, %v567_v53 }
 0x38a   :  { %v570_v57 = vpop.f32.mrf.mxu0 }
 0x38b   :  { %v612_v0 = vadd.f32 %v611_v61, %v570_v57 }
 0x392   :  { %v573_v55 = vpop.f32.mrf.mxu0 }
 0x393   :  { %v615_v11 = vadd.f32 %v614_v9, %v573_v55 }
 0x39a   :  { %v576_v15 = vpop.f32.mrf.mxu0 }
 0x39b   :  { %v618_v18 = vadd.f32 %v617_v17, %v576_v15 }
 0x3a1   :  { %v637_v44 = vpop.f32.mrf.mxu1 }
 0x3a2   :  { %v649_v45 = vmul.f32 2.0, %v637_v44 }
 0x3a4   :  { %v653_v5 = vsub.f32 %v649_v45, %v496_v33 }
 0x3a6   :  { %794 = vmatmul.msk.f32.vlgmr.msra.gmra.mxu2 %vm87_vm2, %v653_v5 }
 0x3a9   :  { %v640_v6 = vpop.f32.mrf.mxu1 }
 0x3aa   :  { %v650_v46 = vmul.f32 2.0, %v640_v6 }
 0x3ac   :  { %v654_v47 = vsub.f32 %v650_v46, %v497_v31 }
 0x3ae   :  { %795 = vmatmul.msk.f32.gmra.mxu2 %vm87_vm2, %v654_v47 }
 0x3b1   :  { %v643_v7 = vpop.f32.mrf.mxu1 }
 0x3b2   :  { %v651_v8 = vmul.f32 2.0, %v643_v7 }
 0x3b4   :  { %v655_v48 = vsub.f32 %v651_v8, %v1113_v43 }
 0x3b6   :  { %796 = vmatmul.msk.f32.gmra.mxu2 %vm87_vm2, %v655_v48 }
 0x3b9   :  { %v646_v50 = vpop.f32.mrf.mxu1 }
 0x3ba   :  { %v652_v51 = vmul.f32 2.0, %v646_v50 }
 0x3bc   :  { %v656_v52 = vsub.f32 %v652_v51, %v1110_v21 }
 0x3be   :  { %797 = vmatmul.msk.f32.gmra.mxu2 %vm87_vm2, %v656_v52 }
 0x429   :  { %v691_v58 = vpop.f32.mrf.mxu2 }
 0x42a   :  { %v703_v59 = vadd.f32 %v691_v58, %v609_v49 }
 0x42c   :  { %v711_v62 = vadd.f32 %v812_v54, %v703_v59 }
 0x42e   :  { %vm715_vm5 = vcmp.ge.f32.partialorder %v711_v62, 0.0  ;;  %v719_v63 = vmul.f32 0.01, %v711_v62 }
 0x430   :  { %v723_v1 = vsel %vm715_vm5, %v711_v62, %v719_v63 }
 0x431   :  { %727 = vst.msk [vmem:[#allocation9] sm:$0xff] %vm87_vm2, %v723_v1  ;;  %v694_v2 = vpop.f32.mrf.mxu2 }
 0x432   :  { %v704_v4 = vadd.f32 %v694_v2, %v612_v0 }
 0x434   :  { %v712_v60 = vadd.f32 %v812_v54, %v704_v4 }
 0x436   :  { %vm716_vm6 = vcmp.ge.f32.partialorder %v712_v60, 0.0  ;;  %v720_v10 = vmul.f32 0.01, %v712_v60 }
 0x438   :  { %v724_v3 = vsel %vm716_vm6, %v712_v60, %v720_v10 }
 0x439   :  { %728 = vst.msk [vmem:[#allocation9 + $0x8] sm:$0xff] %vm87_vm2, %v724_v3  ;;  %v697_v12 = vpop.f32.mrf.mxu2 }
 0x43a   :  { %v705_v13 = vadd.f32 %v697_v12, %v615_v11 }
 0x43c   :  { %v713_v14 = vadd.f32 %v812_v54, %v705_v13 }
 0x43e   :  { %vm717_vm7 = vcmp.ge.f32.partialorder %v713_v14, 0.0  ;;  %v721_v16 = vmul.f32 0.01, %v713_v14 }
 0x440   :  { %v725_v19 = vsel %vm717_vm7, %v713_v14, %v721_v16 }
 0x441   :  { %729 = vst.msk [vmem:[#allocation9 + $0x10] sm:$0xff] %vm87_vm2, %v725_v19  ;;  %v700_v20 = vpop.f32.mrf.mxu2 }
 0x442   :  { %v706_v21 = vadd.f32 %v700_v20, %v618_v18 }
 0x444   :  { %v714_v22 = vadd.f32 %v812_v54, %v706_v21 }
 0x446   :  { %vm718_vm8 = vcmp.ge.f32.partialorder %v714_v22, 0.0  ;;  %v722_v23 = vmul.f32 0.01, %v714_v22 }
 0x448   :  { %v726_v43 = vsel %vm718_vm8, %v714_v22, %v722_v23 }
 0x449   :  { %730 = vst.msk [vmem:[#allocation9 + $0x18] sm:$0xff] %vm87_vm2, %v726_v43 }
 0x44a   :  { %743 = dma.vmem_to_hbm [thread:$0]  %s736_s26, 512, %s738_s8, [#allocation4], %s919_s21, %s919_s21, %s920_s22  }
 0x44b   :  { %913 = dma.done.wait [#allocation4], 512  }
 0x44c   :  { %914 = vsyncadd [#allocation4], 4294966784 }
 0x44d   :  { %748 = vsyncpa [#allocation3], 1 }
 0x44e   :  { %749 = vsyncpa [#allocation7], 1 }
 0x44f   :  { %750 = vsyncpa [#allocation4], 1 }
 0x450   :  { %751 = vsyncpa [#allocation5], 1 }

</bundles_post_ra>
